<compile_context>
chip_gen: v6e
topology: v6e:2x2x1
jax: 0.10.0
libtpu: 0.0.40
codegen_flags: <defaults>
</compile_context>

<pallas_src>
import functools

import jax
import jax.numpy as jnp
from jax import lax
from jax.experimental import pallas as pl
from jax.experimental.pallas import tpu as pltpu

HID1, HID2 = 256, 128      # hidden widths from the module definition
PAD = 128                  # lane padding for the 2-wide / 1-wide output layers
N_MC = 10                  # MC-dropout passes for the epistemic head
DROPOUT_RATE = 0.3

# output-slab column assignment
COL_ALE, COL_EPI, COL_CONF = 0, 1, 2


def _round_up(x, m):
    return (x + m - 1) // m * m


def _gelu(x):
    # NOTE: tanh-approx GELU (|err| < ~1e-3 vs torch.nn.GELU's exact erf form);
    # tanh is guaranteed to lower on the TPU EUP.
    c = 0.7978845608028654  # sqrt(2/pi)
    return 0.5 * x * (1.0 + jnp.tanh(c * (x + 0.044715 * x * x * x)))


def _softplus(x):
    # matches torch.nn.functional.softplus (threshold=20)
    return jnp.where(x > 20.0, x, jnp.log(1.0 + jnp.exp(jnp.minimum(x, 20.0))))


def uncertainty_kernel(*refs, training, tb):
    if training:
        (feat_ref, w1_ref, b1_ref, whe_ref, bhe_ref, wh2_ref, bh2_ref,
         we2_ref, be2_ref, mf_ref, mh_ref, me_ref, out_ref) = refs
    else:
        (feat_ref, w1_ref, b1_ref, whe_ref, bhe_ref, wh2_ref, bh2_ref,
         we2_ref, be2_ref, out_ref) = refs

    f32 = jnp.float32
    x = feat_ref[...].astype(f32)                                   # [TB, D]

    # --- uncertainty_feature_extractor: Linear -> GELU -> Dropout ------------
    u = jnp.dot(x, w1_ref[...], preferred_element_type=f32) + b1_ref[...]
    u = _gelu(u)                                                    # [TB, 256]
    if training:
        u = u * mf_ref[...]            # pre-scaled inverted-dropout mask

    # --- fused first Linear of uncertainty_head | epistemic_head -------------
    # whe = [wh1 | we1] : [256, 256] (N=256 matches the v6e/v7x 2x256 MXU natively)
    he = jnp.dot(u, whe_ref[...], preferred_element_type=f32) + bhe_ref[...]
    he = _gelu(he)                                                  # [TB, 256]

    # --- uncertainty_head tail: Dropout -> Linear(128 -> 2, lane-padded) -----
    h = he[:, :HID2]
    if training:
        h = h * mh_ref[...]
    p = jnp.dot(h, wh2_ref[...], preferred_element_type=f32) + bh2_ref[...]
    confidence = p[:, 0:1]                                          # [TB, 1]
    log_var = p[:, 1:2]                                             # [TB, 1]

    # --- epistemic_head: 10 MC-dropout passes, unbiased std over passes ------
    if training:
        e_pre = he[:, HID2:]           # loop-invariant: computed exactly once
        # stack the 10 masked copies on the sublane axis -> ONE MXU matmul (M=N_MC*TB)
        e_stack = jnp.concatenate(
            [e_pre * me_ref[m] for m in range(N_MC)], axis=0)       # [N_MC*TB, 128]
        eo = jnp.dot(e_stack, we2_ref[...], preferred_element_type=f32) + be2_ref[...]
        e0 = eo[:, 0:1]                                             # [N_MC*TB, 1]
        # two-pass std (avoids catastrophic cancellation of ss - s^2/N at N=10)
        mean = jnp.zeros((tb, 1), f32)
        for m in range(N_MC):
            mean = mean + e0[m * tb:(m + 1) * tb, :]
        mean = mean * (1.0 / N_MC)
        var = jnp.zeros((tb, 1), f32)
        for m in range(N_MC):
            d = e0[m * tb:(m + 1) * tb, :] - mean
            var = var + d * d
        epi = jnp.sqrt(var * (1.0 / (N_MC - 1)))                    # Bessel (n-1)
    else:
        epi = jnp.zeros((tb, 1), f32)

    ale = _softplus(log_var)
    conf = jax.nn.sigmoid(confidence)

    # --- single lane-dense output slab: col0=aleatoric, col1=epistemic, col2=conf
    lane = lax.broadcasted_iota(jnp.int32, (tb, PAD), 1)
    slab = jnp.where(lane == COL_ALE, ale,
                     jnp.where(lane == COL_EPI, epi,
                               jnp.where(lane == COL_CONF, conf, 0.0)))
    out_ref[...] = slab


def init_params(key, input_dim):
    """PyTorch-Linear-style init (uniform +-1/sqrt(fan_in)), repacked for the kernel:
       - wh1|we1 fused into whe [256,256] (bh1|be1 -> bhe [1,256])
       - the 2-wide / 1-wide output layers zero-padded to 128 lanes."""
    ks = jax.random.split(key, 5)

    def lin(k, fan_in, fan_out):
        kw, kb = jax.random.split(k)
        bound = 1.0 / jnp.sqrt(jnp.float32(fan_in))
        w = jax.random.uniform(kw, (fan_in, fan_out), jnp.float32, -bound, bound)
        b = jax.random.uniform(kb, (1, fan_out), jnp.float32, -bound, bound)
        return w, b

    w1, b1 = lin(ks[0], input_dim, HID1)
    wh1, bh1 = lin(ks[1], HID1, HID2)
    wh2, bh2 = lin(ks[2], HID2, 2)
    we1, be1 = lin(ks[3], HID1, HID2)
    we2, be2 = lin(ks[4], HID2, 1)

    whe = jnp.concatenate([wh1, we1], axis=1)                 # [256, 256]
    bhe = jnp.concatenate([bh1, be1], axis=1)                 # [1, 256]

    wh2p = jnp.zeros((HID2, PAD), jnp.float32).at[:, :2].set(wh2)
    bh2p = jnp.zeros((1, PAD), jnp.float32).at[:, :2].set(bh2)
    we2p = jnp.zeros((HID2, PAD), jnp.float32).at[:, :1].set(we2)
    be2p = jnp.zeros((1, PAD), jnp.float32).at[:, :1].set(be2)

    return dict(w1=w1, b1=b1, whe=whe, bhe=bhe,
                wh2=wh2p, bh2=bh2p, we2=we2p, be2=be2p)


_PARAM_ORDER = ['w1', 'b1', 'whe', 'bhe', 'wh2', 'bh2', 'we2', 'be2']


def _full_spec(shape):
    nd = len(shape)
    return pl.BlockSpec(shape, lambda i: (0,) * nd)   # constant index -> VMEM-resident


def uncertainty_forward(params, features, branch_predictions, *,
                        dropout_key=None, training=True, block_b=128):
    B, D = features.shape

    # batch tiling: sublane-aligned tile; grid iterates (pipelines) over batch tiles
    TB = min(_round_up(block_b, 8), _round_up(B, 8))
    B_pad = _round_up(B, TB)
    grid = (B_pad // TB,)

    feat = features
    if B_pad != B:
        feat = jnp.pad(features, ((0, B_pad - B), (0, 0)))

    in_arrays = [feat] + [params[n] for n in _PARAM_ORDER]
    in_specs = [pl.BlockSpec((TB, D), lambda i: (i, 0))] + \
               [_full_spec(params[n].shape) for n in _PARAM_ORDER]

    if training:
        # Dropout randomness is generated host-side (jax.random) and passed in as
        # pre-scaled inverted-dropout masks; this avoids pltpu.prng_* (which does
        # not lower in TPU-interpret mode) and gives per-sample masks for free.
        if dropout_key is None:
            dropout_key = jax.random.PRNGKey(0)
        k1, k2, k3 = jax.random.split(dropout_key, 3)
        keep = 1.0 - DROPOUT_RATE
        scale = 1.0 / keep
        mf = jax.random.bernoulli(k1, keep, (B_pad, HID1)).astype(jnp.float32) * scale
        mh = jax.random.bernoulli(k2, keep, (B_pad, HID2)).astype(jnp.float32) * scale
        me = jax.random.bernoulli(k3, keep, (N_MC, B_pad, HID2)).astype(jnp.float32) * scale
        in_arrays += [mf, mh, me]
        in_specs += [pl.BlockSpec((TB, HID1), lambda i: (i, 0)),
                     pl.BlockSpec((TB, HID2), lambda i: (i, 0)),
                     pl.BlockSpec((N_MC, TB, HID2), lambda i: (0, i, 0))]

    kern = functools.partial(uncertainty_kernel, training=training, tb=TB)

    out = pl.pallas_call(
        kern,
        out_shape=jax.ShapeDtypeStruct((B_pad, PAD), jnp.float32),
        grid=grid,
        in_specs=in_specs,
        out_specs=pl.BlockSpec((TB, PAD), lambda i: (i, 0)),
        compiler_params=pltpu.CompilerParams(
            dimension_semantics=("parallel",)),   # batch tiles shard across v7x's 2 TCs
    )(*in_arrays)

    ale = out[:B, COL_ALE]
    conf = out[:B, COL_CONF]
    if training:
        epistemic = out[:B, COL_EPI]              # std over 10 MC-dropout passes
    else:
        epistemic = jnp.zeros_like(branch_predictions)

    return {
        'prediction': branch_predictions,
        'aleatoric_uncertainty': ale,
        'epistemic_uncertainty': epistemic,
        'aleatoric_uncertainty_confidence_score': conf,
    }


def _ref_eval(params, features):
    """Pure-JAX reference for the deterministic (eval) path."""
    u = _gelu(features @ params['w1'] + params['b1'])
    he = _gelu(u @ params['whe'] + params['bhe'])
    h = he[:, :HID2]
    p = h @ params['wh2'] + params['bh2']
    return _softplus(p[:, 1]), jax.nn.sigmoid(p[:, 0])


if __name__ == "__main__":
    import numpy as np

    B, INPUT_DIM = 8, 32
    key = jax.random.PRNGKey(0)
    kp, kf, kb, kd = jax.random.split(key, 4)

    params = init_params(kp, INPUT_DIM)
    features = jax.random.normal(kf, (B, INPUT_DIM), jnp.float32)
    branch_predictions = jax.random.normal(kb, (B,), jnp.float32)

    # training path (MC-dropout epistemic head active)
    out = uncertainty_forward(params, features, branch_predictions,
                              dropout_key=kd, training=True)
    jax.block_until_ready(out)

    # eval path (epistemic = zeros_like(preds), no dropout)
    out_eval = uncertainty_forward(params, features, branch_predictions,
                                   training=False)
    jax.block_until_ready(out_eval)

    # sanity: deterministic path vs pure-JAX reference
    ref_ale, ref_conf = _ref_eval(params, features)
    np.testing.assert_allclose(np.asarray(out_eval['aleatoric_uncertainty']),
                               np.asarray(ref_ale), rtol=1e-2, atol=1e-2)
    np.testing.assert_allclose(
        np.asarray(out_eval['aleatoric_uncertainty_confidence_score']),
        np.asarray(ref_conf), rtol=1e-2, atol=1e-2)
    assert np.all(np.asarray(out_eval['epistemic_uncertainty']) == 0.0)

    print("KERNEL_OK")
</pallas_src>

<mosaic_0001>
module attributes {stable_mosaic.version = 11 : i64} {
  func.func @uncertainty_kernel(%arg0: i32, %arg1: memref<8x32xf32, #tpu.memory_space<vmem>>, %arg2: memref<32x256xf32, #tpu.memory_space<vmem>>, %arg3: memref<1x256xf32, #tpu.memory_space<vmem>>, %arg4: memref<256x256xf32, #tpu.memory_space<vmem>>, %arg5: memref<1x256xf32, #tpu.memory_space<vmem>>, %arg6: memref<128x128xf32, #tpu.memory_space<vmem>>, %arg7: memref<1x128xf32, #tpu.memory_space<vmem>>, %arg8: memref<128x128xf32, #tpu.memory_space<vmem>>, %arg9: memref<1x128xf32, #tpu.memory_space<vmem>>, %arg10: memref<8x256xf32, #tpu.memory_space<vmem>>, %arg11: memref<8x128xf32, #tpu.memory_space<vmem>>, %arg12: memref<10x8x128xf32, #tpu.memory_space<vmem>>, %arg13: memref<8x128xf32, #tpu.memory_space<vmem>>) attributes {dimension_semantics = [#tpu.dimension_semantics<parallel>], iteration_bounds = array<i64: 1>, scalar_prefetch = 0 : i64, scratch_operands = 0 : i64, tpu.core_type = #tpu.core_type<tc>, window_params = [{transform_indices = @transform_0, window_bounds = array<i64: 8, 32>}, {pipeline_mode = #tpu.pipeline_mode<synchronous>, transform_indices = @transform_1, window_bounds = array<i64: 32, 256>}, {pipeline_mode = #tpu.pipeline_mode<synchronous>, transform_indices = @transform_2, window_bounds = array<i64: 1, 256>}, {pipeline_mode = #tpu.pipeline_mode<synchronous>, transform_indices = @transform_3, window_bounds = array<i64: 256, 256>}, {pipeline_mode = #tpu.pipeline_mode<synchronous>, transform_indices = @transform_4, window_bounds = array<i64: 1, 256>}, {pipeline_mode = #tpu.pipeline_mode<synchronous>, transform_indices = @transform_5, window_bounds = array<i64: 128, 128>}, {pipeline_mode = #tpu.pipeline_mode<synchronous>, transform_indices = @transform_6, window_bounds = array<i64: 1, 128>}, {pipeline_mode = #tpu.pipeline_mode<synchronous>, transform_indices = @transform_7, window_bounds = array<i64: 128, 128>}, {pipeline_mode = #tpu.pipeline_mode<synchronous>, transform_indices = @transform_8, window_bounds = array<i64: 1, 128>}, {transform_indices = @transform_9, window_bounds = array<i64: 8, 256>}, {transform_indices = @transform_10, window_bounds = array<i64: 8, 128>}, {transform_indices = @transform_11, window_bounds = array<i64: 10, 8, 128>}, {transform_indices = @transform_12, window_bounds = array<i64: 8, 128>}]} {
    %c0 = arith.constant 0 : index
    %c0_0 = arith.constant 0 : index
    %0 = vector.load %arg1[%c0, %c0_0] : memref<8x32xf32, #tpu.memory_space<vmem>>, vector<8x32xf32>
    %c0_1 = arith.constant 0 : index
    %c0_2 = arith.constant 0 : index
    %1 = vector.load %arg2[%c0_1, %c0_2] : memref<32x256xf32, #tpu.memory_space<vmem>>, vector<32x256xf32>
    %cst = arith.constant dense<0.000000e+00> : vector<8x256xf32>
    %2 = tpu.matmul %0, %1, %cst {dimension_numbers = #tpu.dot_dimension_numbers<[1], [0], [0], [1], [0, 0, 1, 1], [], []>} : vector<8x32xf32>, vector<32x256xf32>, vector<8x256xf32> -> vector<8x256xf32>
    %c0_3 = arith.constant 0 : index
    %c0_4 = arith.constant 0 : index
    %3 = vector.load %arg3[%c0_3, %c0_4] : memref<1x256xf32, #tpu.memory_space<vmem>>, vector<1x256xf32>
    %4 = vector.broadcast %3 : vector<1x256xf32> to vector<8x256xf32>
    %5 = arith.addf %2, %4 : vector<8x256xf32>
    %cst_5 = arith.constant 5.000000e-01 : f32
    %6 = vector.broadcast %cst_5 : f32 to vector<8x256xf32>
    %7 = arith.mulf %6, %5 : vector<8x256xf32>
    %cst_6 = arith.constant 4.471500e-02 : f32
    %8 = vector.broadcast %cst_6 : f32 to vector<8x256xf32>
    %9 = arith.mulf %8, %5 : vector<8x256xf32>
    %10 = arith.mulf %9, %5 : vector<8x256xf32>
    %11 = arith.mulf %10, %5 : vector<8x256xf32>
    %12 = arith.addf %5, %11 : vector<8x256xf32>
    %cst_7 = arith.constant 0.797884583 : f32
    %13 = vector.broadcast %cst_7 : f32 to vector<8x256xf32>
    %14 = arith.mulf %13, %12 : vector<8x256xf32>
    %15 = math.tanh %14 : vector<8x256xf32>
    %cst_8 = arith.constant 1.000000e+00 : f32
    %16 = vector.broadcast %cst_8 : f32 to vector<8x256xf32>
    %17 = arith.addf %16, %15 : vector<8x256xf32>
    %18 = arith.mulf %7, %17 : vector<8x256xf32>
    %c0_9 = arith.constant 0 : index
    %c0_10 = arith.constant 0 : index
    %19 = vector.load %arg10[%c0_9, %c0_10] : memref<8x256xf32, #tpu.memory_space<vmem>>, vector<8x256xf32>
    %20 = arith.mulf %18, %19 : vector<8x256xf32>
    %c0_11 = arith.constant 0 : index
    %c0_12 = arith.constant 0 : index
    %21 = vector.load %arg4[%c0_11, %c0_12] : memref<256x256xf32, #tpu.memory_space<vmem>>, vector<256x256xf32>
    %cst_13 = arith.constant dense<0.000000e+00> : vector<8x256xf32>
    %22 = tpu.matmul %20, %21, %cst_13 {dimension_numbers = #tpu.dot_dimension_numbers<[1], [0], [0], [1], [0, 0, 1, 1], [], []>} : vector<8x256xf32>, vector<256x256xf32>, vector<8x256xf32> -> vector<8x256xf32>
    %c0_14 = arith.constant 0 : index
    %c0_15 = arith.constant 0 : index
    %23 = vector.load %arg5[%c0_14, %c0_15] : memref<1x256xf32, #tpu.memory_space<vmem>>, vector<1x256xf32>
    %24 = vector.broadcast %23 : vector<1x256xf32> to vector<8x256xf32>
    %25 = arith.addf %22, %24 : vector<8x256xf32>
    %cst_16 = arith.constant 5.000000e-01 : f32
    %26 = vector.broadcast %cst_16 : f32 to vector<8x256xf32>
    %27 = arith.mulf %26, %25 : vector<8x256xf32>
    %cst_17 = arith.constant 4.471500e-02 : f32
    %28 = vector.broadcast %cst_17 : f32 to vector<8x256xf32>
    %29 = arith.mulf %28, %25 : vector<8x256xf32>
    %30 = arith.mulf %29, %25 : vector<8x256xf32>
    %31 = arith.mulf %30, %25 : vector<8x256xf32>
    %32 = arith.addf %25, %31 : vector<8x256xf32>
    %cst_18 = arith.constant 0.797884583 : f32
    %33 = vector.broadcast %cst_18 : f32 to vector<8x256xf32>
    %34 = arith.mulf %33, %32 : vector<8x256xf32>
    %35 = math.tanh %34 : vector<8x256xf32>
    %cst_19 = arith.constant 1.000000e+00 : f32
    %36 = vector.broadcast %cst_19 : f32 to vector<8x256xf32>
    %37 = arith.addf %36, %35 : vector<8x256xf32>
    %38 = arith.mulf %27, %37 : vector<8x256xf32>
    %39 = vector.extract_strided_slice %38 {offsets = [0, 0], sizes = [8, 128], strides = [1, 1]} : vector<8x256xf32> to vector<8x128xf32>
    %c0_20 = arith.constant 0 : index
    %c0_21 = arith.constant 0 : index
    %40 = vector.load %arg11[%c0_20, %c0_21] : memref<8x128xf32, #tpu.memory_space<vmem>>, vector<8x128xf32>
    %41 = arith.mulf %39, %40 : vector<8x128xf32>
    %c0_22 = arith.constant 0 : index
    %c0_23 = arith.constant 0 : index
    %42 = vector.load %arg6[%c0_22, %c0_23] : memref<128x128xf32, #tpu.memory_space<vmem>>, vector<128x128xf32>
    %cst_24 = arith.constant dense<0.000000e+00> : vector<8x128xf32>
    %43 = tpu.matmul %41, %42, %cst_24 {dimension_numbers = #tpu.dot_dimension_numbers<[1], [0], [0], [1], [0, 0, 1, 1], [], []>} : vector<8x128xf32>, vector<128x128xf32>, vector<8x128xf32> -> vector<8x128xf32>
    %c0_25 = arith.constant 0 : index
    %c0_26 = arith.constant 0 : index
    %44 = vector.load %arg7[%c0_25, %c0_26] : memref<1x128xf32, #tpu.memory_space<vmem>>, vector<1x128xf32>
    %45 = vector.broadcast %44 : vector<1x128xf32> to vector<8x128xf32>
    %46 = arith.addf %43, %45 : vector<8x128xf32>
    %47 = vector.extract_strided_slice %46 {offsets = [0, 0], sizes = [8, 1], strides = [1, 1]} : vector<8x128xf32> to vector<8x1xf32>
    %48 = vector.extract_strided_slice %46 {offsets = [0, 1], sizes = [8, 1], strides = [1, 1]} : vector<8x128xf32> to vector<8x1xf32>
    %49 = vector.extract_strided_slice %38 {offsets = [0, 128], sizes = [8, 128], strides = [1, 1]} : vector<8x256xf32> to vector<8x128xf32>
    %c0_27 = arith.constant 0 : index
    %c0_28 = arith.constant 0 : index
    %c0_29 = arith.constant 0 : index
    %50 = vector.load %arg12[%c0_27, %c0_28, %c0_29] : memref<10x8x128xf32, #tpu.memory_space<vmem>>, vector<1x8x128xf32>
    %51 = vector.shape_cast %50 : vector<1x8x128xf32> to vector<8x128xf32>
    %52 = arith.mulf %49, %51 : vector<8x128xf32>
    %c1 = arith.constant 1 : index
    %c0_30 = arith.constant 0 : index
    %c0_31 = arith.constant 0 : index
    %53 = vector.load %arg12[%c1, %c0_30, %c0_31] : memref<10x8x128xf32, #tpu.memory_space<vmem>>, vector<1x8x128xf32>
    %54 = vector.shape_cast %53 : vector<1x8x128xf32> to vector<8x128xf32>
    %55 = arith.mulf %49, %54 : vector<8x128xf32>
    %c2 = arith.constant 2 : index
    %c0_32 = arith.constant 0 : index
    %c0_33 = arith.constant 0 : index
    %56 = vector.load %arg12[%c2, %c0_32, %c0_33] : memref<10x8x128xf32, #tpu.memory_space<vmem>>, vector<1x8x128xf32>
    %57 = vector.shape_cast %56 : vector<1x8x128xf32> to vector<8x128xf32>
    %58 = arith.mulf %49, %57 : vector<8x128xf32>
    %c3 = arith.constant 3 : index
    %c0_34 = arith.constant 0 : index
    %c0_35 = arith.constant 0 : index
    %59 = vector.load %arg12[%c3, %c0_34, %c0_35] : memref<10x8x128xf32, #tpu.memory_space<vmem>>, vector<1x8x128xf32>
    %60 = vector.shape_cast %59 : vector<1x8x128xf32> to vector<8x128xf32>
    %61 = arith.mulf %49, %60 : vector<8x128xf32>
    %c4 = arith.constant 4 : index
    %c0_36 = arith.constant 0 : index
    %c0_37 = arith.constant 0 : index
    %62 = vector.load %arg12[%c4, %c0_36, %c0_37] : memref<10x8x128xf32, #tpu.memory_space<vmem>>, vector<1x8x128xf32>
    %63 = vector.shape_cast %62 : vector<1x8x128xf32> to vector<8x128xf32>
    %64 = arith.mulf %49, %63 : vector<8x128xf32>
    %c5 = arith.constant 5 : index
    %c0_38 = arith.constant 0 : index
    %c0_39 = arith.constant 0 : index
    %65 = vector.load %arg12[%c5, %c0_38, %c0_39] : memref<10x8x128xf32, #tpu.memory_space<vmem>>, vector<1x8x128xf32>
    %66 = vector.shape_cast %65 : vector<1x8x128xf32> to vector<8x128xf32>
    %67 = arith.mulf %49, %66 : vector<8x128xf32>
    %c6 = arith.constant 6 : index
    %c0_40 = arith.constant 0 : index
    %c0_41 = arith.constant 0 : index
    %68 = vector.load %arg12[%c6, %c0_40, %c0_41] : memref<10x8x128xf32, #tpu.memory_space<vmem>>, vector<1x8x128xf32>
    %69 = vector.shape_cast %68 : vector<1x8x128xf32> to vector<8x128xf32>
    %70 = arith.mulf %49, %69 : vector<8x128xf32>
    %c7 = arith.constant 7 : index
    %c0_42 = arith.constant 0 : index
    %c0_43 = arith.constant 0 : index
    %71 = vector.load %arg12[%c7, %c0_42, %c0_43] : memref<10x8x128xf32, #tpu.memory_space<vmem>>, vector<1x8x128xf32>
    %72 = vector.shape_cast %71 : vector<1x8x128xf32> to vector<8x128xf32>
    %73 = arith.mulf %49, %72 : vector<8x128xf32>
    %c8 = arith.constant 8 : index
    %c0_44 = arith.constant 0 : index
    %c0_45 = arith.constant 0 : index
    %74 = vector.load %arg12[%c8, %c0_44, %c0_45] : memref<10x8x128xf32, #tpu.memory_space<vmem>>, vector<1x8x128xf32>
    %75 = vector.shape_cast %74 : vector<1x8x128xf32> to vector<8x128xf32>
    %76 = arith.mulf %49, %75 : vector<8x128xf32>
    %c9 = arith.constant 9 : index
    %c0_46 = arith.constant 0 : index
    %c0_47 = arith.constant 0 : index
    %77 = vector.load %arg12[%c9, %c0_46, %c0_47] : memref<10x8x128xf32, #tpu.memory_space<vmem>>, vector<1x8x128xf32>
    %78 = vector.shape_cast %77 : vector<1x8x128xf32> to vector<8x128xf32>
    %79 = arith.mulf %49, %78 : vector<8x128xf32>
    %80 = tpu.concatenate %52, %55, %58, %61, %64, %67, %70, %73, %76, %79 in 0 : vector<8x128xf32>, vector<8x128xf32>, vector<8x128xf32>, vector<8x128xf32>, vector<8x128xf32>, vector<8x128xf32>, vector<8x128xf32>, vector<8x128xf32>, vector<8x128xf32>, vector<8x128xf32> -> vector<80x128xf32>
    %c0_48 = arith.constant 0 : index
    %c0_49 = arith.constant 0 : index
    %81 = vector.load %arg8[%c0_48, %c0_49] : memref<128x128xf32, #tpu.memory_space<vmem>>, vector<128x128xf32>
    %cst_50 = arith.constant dense<0.000000e+00> : vector<80x128xf32>
    %82 = tpu.matmul %80, %81, %cst_50 {dimension_numbers = #tpu.dot_dimension_numbers<[1], [0], [0], [1], [0, 0, 1, 1], [], []>} : vector<80x128xf32>, vector<128x128xf32>, vector<80x128xf32> -> vector<80x128xf32>
    %c0_51 = arith.constant 0 : index
    %c0_52 = arith.constant 0 : index
    %83 = vector.load %arg9[%c0_51, %c0_52] : memref<1x128xf32, #tpu.memory_space<vmem>>, vector<1x128xf32>
    %84 = vector.broadcast %83 : vector<1x128xf32> to vector<80x128xf32>
    %85 = arith.addf %82, %84 : vector<80x128xf32>
    %86 = vector.extract_strided_slice %85 {offsets = [0, 0], sizes = [80, 1], strides = [1, 1]} : vector<80x128xf32> to vector<80x1xf32>
    %cst_53 = arith.constant 0.000000e+00 : f32
    %87 = vector.broadcast %cst_53 : f32 to vector<8x1xf32>
    %88 = vector.extract_strided_slice %86 {offsets = [0, 0], sizes = [8, 1], strides = [1, 1]} : vector<80x1xf32> to vector<8x1xf32>
    %89 = arith.addf %87, %88 : vector<8x1xf32>
    %90 = vector.extract_strided_slice %86 {offsets = [8, 0], sizes = [8, 1], strides = [1, 1]} : vector<80x1xf32> to vector<8x1xf32>
    %91 = arith.addf %89, %90 : vector<8x1xf32>
    %92 = vector.extract_strided_slice %86 {offsets = [16, 0], sizes = [8, 1], strides = [1, 1]} : vector<80x1xf32> to vector<8x1xf32>
    %93 = arith.addf %91, %92 : vector<8x1xf32>
    %94 = vector.extract_strided_slice %86 {offsets = [24, 0], sizes = [8, 1], strides = [1, 1]} : vector<80x1xf32> to vector<8x1xf32>
    %95 = arith.addf %93, %94 : vector<8x1xf32>
    %96 = vector.extract_strided_slice %86 {offsets = [32, 0], sizes = [8, 1], strides = [1, 1]} : vector<80x1xf32> to vector<8x1xf32>
    %97 = arith.addf %95, %96 : vector<8x1xf32>
    %98 = vector.extract_strided_slice %86 {offsets = [40, 0], sizes = [8, 1], strides = [1, 1]} : vector<80x1xf32> to vector<8x1xf32>
    %99 = arith.addf %97, %98 : vector<8x1xf32>
    %100 = vector.extract_strided_slice %86 {offsets = [48, 0], sizes = [8, 1], strides = [1, 1]} : vector<80x1xf32> to vector<8x1xf32>
    %101 = arith.addf %99, %100 : vector<8x1xf32>
    %102 = vector.extract_strided_slice %86 {offsets = [56, 0], sizes = [8, 1], strides = [1, 1]} : vector<80x1xf32> to vector<8x1xf32>
    %103 = arith.addf %101, %102 : vector<8x1xf32>
    %104 = vector.extract_strided_slice %86 {offsets = [64, 0], sizes = [8, 1], strides = [1, 1]} : vector<80x1xf32> to vector<8x1xf32>
    %105 = arith.addf %103, %104 : vector<8x1xf32>
    %106 = vector.extract_strided_slice %86 {offsets = [72, 0], sizes = [8, 1], strides = [1, 1]} : vector<80x1xf32> to vector<8x1xf32>
    %107 = arith.addf %105, %106 : vector<8x1xf32>
    %cst_54 = arith.constant 1.000000e-01 : f32
    %108 = vector.broadcast %cst_54 : f32 to vector<8x1xf32>
    %109 = arith.mulf %107, %108 : vector<8x1xf32>
    %cst_55 = arith.constant 0.000000e+00 : f32
    %110 = vector.broadcast %cst_55 : f32 to vector<8x1xf32>
    %111 = vector.extract_strided_slice %86 {offsets = [0, 0], sizes = [8, 1], strides = [1, 1]} : vector<80x1xf32> to vector<8x1xf32>
    %112 = arith.subf %111, %109 : vector<8x1xf32>
    %113 = arith.mulf %112, %112 : vector<8x1xf32>
    %114 = arith.addf %110, %113 : vector<8x1xf32>
    %115 = vector.extract_strided_slice %86 {offsets = [8, 0], sizes = [8, 1], strides = [1, 1]} : vector<80x1xf32> to vector<8x1xf32>
    %116 = arith.subf %115, %109 : vector<8x1xf32>
    %117 = arith.mulf %116, %116 : vector<8x1xf32>
    %118 = arith.addf %114, %117 : vector<8x1xf32>
    %119 = vector.extract_strided_slice %86 {offsets = [16, 0], sizes = [8, 1], strides = [1, 1]} : vector<80x1xf32> to vector<8x1xf32>
    %120 = arith.subf %119, %109 : vector<8x1xf32>
    %121 = arith.mulf %120, %120 : vector<8x1xf32>
    %122 = arith.addf %118, %121 : vector<8x1xf32>
    %123 = vector.extract_strided_slice %86 {offsets = [24, 0], sizes = [8, 1], strides = [1, 1]} : vector<80x1xf32> to vector<8x1xf32>
    %124 = arith.subf %123, %109 : vector<8x1xf32>
    %125 = arith.mulf %124, %124 : vector<8x1xf32>
    %126 = arith.addf %122, %125 : vector<8x1xf32>
    %127 = vector.extract_strided_slice %86 {offsets = [32, 0], sizes = [8, 1], strides = [1, 1]} : vector<80x1xf32> to vector<8x1xf32>
    %128 = arith.subf %127, %109 : vector<8x1xf32>
    %129 = arith.mulf %128, %128 : vector<8x1xf32>
    %130 = arith.addf %126, %129 : vector<8x1xf32>
    %131 = vector.extract_strided_slice %86 {offsets = [40, 0], sizes = [8, 1], strides = [1, 1]} : vector<80x1xf32> to vector<8x1xf32>
    %132 = arith.subf %131, %109 : vector<8x1xf32>
    %133 = arith.mulf %132, %132 : vector<8x1xf32>
    %134 = arith.addf %130, %133 : vector<8x1xf32>
    %135 = vector.extract_strided_slice %86 {offsets = [48, 0], sizes = [8, 1], strides = [1, 1]} : vector<80x1xf32> to vector<8x1xf32>
    %136 = arith.subf %135, %109 : vector<8x1xf32>
    %137 = arith.mulf %136, %136 : vector<8x1xf32>
    %138 = arith.addf %134, %137 : vector<8x1xf32>
    %139 = vector.extract_strided_slice %86 {offsets = [56, 0], sizes = [8, 1], strides = [1, 1]} : vector<80x1xf32> to vector<8x1xf32>
    %140 = arith.subf %139, %109 : vector<8x1xf32>
    %141 = arith.mulf %140, %140 : vector<8x1xf32>
    %142 = arith.addf %138, %141 : vector<8x1xf32>
    %143 = vector.extract_strided_slice %86 {offsets = [64, 0], sizes = [8, 1], strides = [1, 1]} : vector<80x1xf32> to vector<8x1xf32>
    %144 = arith.subf %143, %109 : vector<8x1xf32>
    %145 = arith.mulf %144, %144 : vector<8x1xf32>
    %146 = arith.addf %142, %145 : vector<8x1xf32>
    %147 = vector.extract_strided_slice %86 {offsets = [72, 0], sizes = [8, 1], strides = [1, 1]} : vector<80x1xf32> to vector<8x1xf32>
    %148 = arith.subf %147, %109 : vector<8x1xf32>
    %149 = arith.mulf %148, %148 : vector<8x1xf32>
    %150 = arith.addf %146, %149 : vector<8x1xf32>
    %cst_56 = arith.constant 0.111111112 : f32
    %151 = vector.broadcast %cst_56 : f32 to vector<8x1xf32>
    %152 = arith.mulf %150, %151 : vector<8x1xf32>
    %153 = math.sqrt %152 : vector<8x1xf32>
    %cst_57 = arith.constant 2.000000e+01 : f32
    %154 = vector.broadcast %cst_57 : f32 to vector<8x1xf32>
    %155 = arith.cmpf ogt, %48, %154 : vector<8x1xf32>
    %cst_58 = arith.constant 2.000000e+01 : f32
    %156 = vector.broadcast %cst_58 : f32 to vector<8x1xf32>
    %157 = arith.minimumf %48, %156 : vector<8x1xf32>
    %158 = math.exp %157 : vector<8x1xf32>
    %cst_59 = arith.constant 1.000000e+00 : f32
    %159 = vector.broadcast %cst_59 : f32 to vector<8x1xf32>
    %160 = arith.addf %159, %158 : vector<8x1xf32>
    %161 = math.log %160 : vector<8x1xf32>
    %162 = arith.select %155, %48, %161 : vector<8x1xi1>, vector<8x1xf32>
    %163 = arith.negf %47 : vector<8x1xf32>
    %164 = math.exp %163 : vector<8x1xf32>
    %cst_60 = arith.constant 1.000000e+00 : f32
    %165 = vector.broadcast %cst_60 : f32 to vector<8x1xf32>
    %166 = arith.addf %165, %164 : vector<8x1xf32>
    %167 = arith.divf %165, %166 : vector<8x1xf32>
    %168 = tpu.iota {dimensions = array<i32: 1>} : vector<8x128xi32>
    %c0_i32 = arith.constant 0 : i32
    %169 = vector.broadcast %c0_i32 : i32 to vector<8x128xi32>
    %170 = arith.cmpi eq, %168, %169 : vector<8x128xi32>
    %c1_i32 = arith.constant 1 : i32
    %171 = vector.broadcast %c1_i32 : i32 to vector<8x128xi32>
    %172 = arith.cmpi eq, %168, %171 : vector<8x128xi32>
    %c2_i32 = arith.constant 2 : i32
    %173 = vector.broadcast %c2_i32 : i32 to vector<8x128xi32>
    %174 = arith.cmpi eq, %168, %173 : vector<8x128xi32>
    %cst_61 = arith.constant 0.000000e+00 : f32
    %175 = vector.shape_cast %167 : vector<8x1xf32> to vector<8x1xf32>
    %176 = vector.broadcast %175 : vector<8x1xf32> to vector<8x128xf32>
    %177 = vector.broadcast %cst_61 : f32 to vector<8x128xf32>
    %178 = arith.select %174, %176, %177 : vector<8x128xi1>, vector<8x128xf32>
    %179 = vector.shape_cast %153 : vector<8x1xf32> to vector<8x1xf32>
    %180 = vector.broadcast %179 : vector<8x1xf32> to vector<8x128xf32>
    %181 = arith.select %172, %180, %178 : vector<8x128xi1>, vector<8x128xf32>
    %182 = vector.shape_cast %162 : vector<8x1xf32> to vector<8x1xf32>
    %183 = vector.broadcast %182 : vector<8x1xf32> to vector<8x128xf32>
    %184 = arith.select %170, %183, %181 : vector<8x128xi1>, vector<8x128xf32>
    %c0_62 = arith.constant 0 : index
    %c0_63 = arith.constant 0 : index
    %185 = vector.load %arg13[%c0_62, %c0_63] : memref<8x128xf32, #tpu.memory_space<vmem>>, vector<8x128xf32>
    tpu.vector_store %arg13[%c0_62, %c0_63], %184 {strides = array<i32>} : memref<8x128xf32, #tpu.memory_space<vmem>>, vector<8x128xf32>,
    return
  }
  func.func @transform_0(%arg0: i32) -> (i32, i32) {
    %c0_i32 = arith.constant 0 : i32
    %c0_i32_0 = arith.constant 0 : i32
    return %arg0, %c0_i32 : i32, i32
  }
  func.func @transform_1(%arg0: i32) -> (i32, i32) {
    %c0_i32 = arith.constant 0 : i32
    %c0_i32_0 = arith.constant 0 : i32
    %c0_i32_1 = arith.constant 0 : i32
    return %c0_i32, %c0_i32_0 : i32, i32
  }
  func.func @transform_2(%arg0: i32) -> (i32, i32) {
    %c0_i32 = arith.constant 0 : i32
    %c0_i32_0 = arith.constant 0 : i32
    %c0_i32_1 = arith.constant 0 : i32
    return %c0_i32, %c0_i32_0 : i32, i32
  }
  func.func @transform_3(%arg0: i32) -> (i32, i32) {
    %c0_i32 = arith.constant 0 : i32
    %c0_i32_0 = arith.constant 0 : i32
    %c0_i32_1 = arith.constant 0 : i32
    return %c0_i32, %c0_i32_0 : i32, i32
  }
  func.func @transform_4(%arg0: i32) -> (i32, i32) {
    %c0_i32 = arith.constant 0 : i32
    %c0_i32_0 = arith.constant 0 : i32
    %c0_i32_1 = arith.constant 0 : i32
    return %c0_i32, %c0_i32_0 : i32, i32
  }
  func.func @transform_5(%arg0: i32) -> (i32, i32) {
    %c0_i32 = arith.constant 0 : i32
    %c0_i32_0 = arith.constant 0 : i32
    %c0_i32_1 = arith.constant 0 : i32
    return %c0_i32, %c0_i32_0 : i32, i32
  }
  func.func @transform_6(%arg0: i32) -> (i32, i32) {
    %c0_i32 = arith.constant 0 : i32
    %c0_i32_0 = arith.constant 0 : i32
    %c0_i32_1 = arith.constant 0 : i32
    return %c0_i32, %c0_i32_0 : i32, i32
  }
  func.func @transform_7(%arg0: i32) -> (i32, i32) {
    %c0_i32 = arith.constant 0 : i32
    %c0_i32_0 = arith.constant 0 : i32
    %c0_i32_1 = arith.constant 0 : i32
    return %c0_i32, %c0_i32_0 : i32, i32
  }
  func.func @transform_8(%arg0: i32) -> (i32, i32) {
    %c0_i32 = arith.constant 0 : i32
    %c0_i32_0 = arith.constant 0 : i32
    %c0_i32_1 = arith.constant 0 : i32
    return %c0_i32, %c0_i32_0 : i32, i32
  }
  func.func @transform_9(%arg0: i32) -> (i32, i32) {
    %c0_i32 = arith.constant 0 : i32
    %c0_i32_0 = arith.constant 0 : i32
    return %arg0, %c0_i32 : i32, i32
  }
  func.func @transform_10(%arg0: i32) -> (i32, i32) {
    %c0_i32 = arith.constant 0 : i32
    %c0_i32_0 = arith.constant 0 : i32
    return %arg0, %c0_i32 : i32, i32
  }
  func.func @transform_11(%arg0: i32) -> (i32, i32, i32) {
    %c0_i32 = arith.constant 0 : i32
    %c0_i32_0 = arith.constant 0 : i32
    %c0_i32_1 = arith.constant 0 : i32
    return %c0_i32, %arg0, %c0_i32_0 : i32, i32, i32
  }
  func.func @transform_12(%arg0: i32) -> (i32, i32) {
    %c0_i32 = arith.constant 0 : i32
    %c0_i32_0 = arith.constant 0 : i32
    return %arg0, %c0_i32 : i32, i32
  }
}

</mosaic_0001>

<bundles_post_ra>
// kernel: tpu_custom_call.1
= control target key start
LH: loop header
LB: loop body
LE: loop exit
PB: predicated region body
PF: predicated region fallthrough
CT: control target
= control target key end

     0   :  { %17 = vsyncpa [#allocation3], 0  ;;  %s1437_s0 = inlined_call_operand.hbm [shape: f32[8,32], index: 0, kind: input, shape index: {}]   ;;  %s1438_s1 = inlined_call_operand.hbm [shape: f32[32,256], index: 1, kind: input, shape index: {}]   ;;  %s1439_s2 = inlined_call_operand.hbm [shape: f32[1,256], index: 2, kind: input, shape index: {}]   ;;  %s1440_s3 = inlined_call_operand.hbm [shape: f32[256,256], index: 3, kind: input, shape index: {}]   ;;  %s1441_s4 = inlined_call_operand.hbm [shape: f32[1,256], index: 4, kind: input, shape index: {}]   ;;  %s1442_s5 = inlined_call_operand.hbm [shape: f32[128,128], index: 5, kind: input, shape index: {}]   ;;  %s1443_s6 = inlined_call_operand.hbm [shape: f32[1,128], index: 6, kind: input, shape index: {}]   ;;  %s1444_s7 = inlined_call_operand.hbm [shape: f32[128,128], index: 7, kind: input, shape index: {}]   ;;  %s1445_s8 = inlined_call_operand.hbm [shape: f32[1,128], index: 8, kind: input, shape index: {}]   ;;  %s1446_s9 = inlined_call_operand.vmem [shape: f32[8,256], index: 9, kind: input, shape index: {}]   ;;  %s1447_s10 = inlined_call_operand.hbm [shape: f32[8,128], index: 10, kind: input, shape index: {}]   ;;  %s1448_s11 = inlined_call_operand.hbm [shape: f32[10,8,128], index: 11, kind: input, shape index: {}]   ;;  %s1449_s12 = inlined_call_operand.hbm [shape: f32[8,128], index: 12, kind: output, shape index: {}]  }
   0x1   :  { %18 = vsyncpa [#allocation6], 0 }
   0x2   :  { %19 = vsyncpa [#allocation9], 0 }
   0x3   :  { %20 = vsyncpa [#allocation12], 0 }
   0x4   :  { %21 = vsyncpa [#allocation15], 0 }
   0x5   :  { %22 = vsyncpa [#allocation18], 0 }
   0x6   :  { %23 = vsyncpa [#allocation4], 0  ;;  %s1255_s21 = smov [#allocation5]  }
   0x7   :  { %s39_s22 = sshll.u32 %s1255_s21, 4  ;;  %s40_s22 = int_to_ptr.vmem [resolvable:$true] %s39_s22 }
   0x8   :  { %s1009_s23 = scalar_lea.vmem %s40_s22, 1024  ;;  %p1014_p1 = scmp.lt.s32.totalorder %s40_s22, %s40_s22 }
   0x9   :  { %p1010_p0 = scmp.ne.s32.totalorder %s40_s22, %s1009_s23  ;;  %p1015_p2 = scmp.lt.s32.totalorder %s1009_s23, %s1009_s23 }
   0xb   :  { %p1016_p3 = por %p1015_p2, %p1014_p1 }
   0xd   :  { %p1017_p4 = pnand %p1016_p3, %p1010_p0 }
   0xf   :  { %1020 = shalt.err (!%p1017_p4)
}
  0x10   :  { %s1256_s24 = smov 256   ;;  %s1257_s25 = smov 16  }
  0x11   :  { %45 = dma.hbm_to_vmem [thread:$0]  %s1438_s1, 1024, %s40_s22, [#allocation6], %s1256_s24, %s1256_s24, %s1257_s25  }
  0x12   :  { %s1258_s28 = smov [#allocation8]   ;;  %s1259_s30 = smov [#allocation11]  }
  0x13   :  { %s61_s29 = sshll.u32 %s1258_s28, 4  ;;  %s83_s13 = sshll.u32 %s1259_s30, 4  ;;  %s62_s29 = int_to_ptr.vmem [resolvable:$true] %s61_s29  ;;  %s84_s13 = int_to_ptr.vmem [resolvable:$true] %s83_s13 }
  0x14   :  { %s1029_s14 = scalar_lea.vmem %s62_s29, 8192  ;;  %p1034_p6 = scmp.lt.s32.totalorder %s62_s29, %s62_s29 }
  0x15   :  { %p1030_p5 = scmp.ne.s32.totalorder %s62_s29, %s1029_s14  ;;  %p1035_p7 = scmp.lt.s32.totalorder %s1029_s14, %s1029_s14 }
  0x17   :  { %p1036_p8 = por %p1035_p7, %p1034_p6 }
  0x19   :  { %p1037_p9 = pnand %p1036_p8, %p1030_p5 }
  0x1b   :  { %1040 = shalt.err (!%p1037_p9)
}
  0x1c   :  { %67 = dma.hbm_to_vmem [thread:$0]  %s1440_s3, 8192, %s62_s29, [#allocation9], %s1256_s24, %s1256_s24, %s1257_s25  }
  0x1d   :  { %s1049_s17 = scalar_lea.vmem %s84_s13, 2048  ;;  %p1054_p11 = scmp.lt.s32.totalorder %s84_s13, %s84_s13 }
  0x1e   :  { %p1050_p10 = scmp.ne.s32.totalorder %s84_s13, %s1049_s17  ;;  %p1055_p12 = scmp.lt.s32.totalorder %s1049_s17, %s1049_s17 }
  0x20   :  { %p1056_p13 = por %p1055_p12, %p1054_p11 }
  0x22   :  { %p1057_p0 = pnand %p1056_p13, %p1050_p10 }
  0x24   :  { %1060 = shalt.err (!%p1057_p0)
}
  0x25   :  { %s1260_s1 = smov 128   ;;  %s1261_s18 = smov 8  }
  0x26   :  { %89 = dma.hbm_to_vmem [thread:$0]  %s1442_s5, 2048, %s84_s13, [#allocation12], %s1260_s1, %s1260_s1, %s1261_s18  }
  0x27   :  { %s1262_s21 = smov [#allocation14]   ;;  %s1263_s3 = smov [#allocation17]  }
  0x28   :  { %s105_s22 = sshll.u32 %s1262_s21, 4  ;;  %s130_s23 = sshll.u32 %s1263_s3, 4  ;;  %s106_s22 = int_to_ptr.vmem [resolvable:$true] %s105_s22  ;;  %s131_s23 = int_to_ptr.vmem [resolvable:$true] %s130_s23 }
  0x29   :  { %s1069_s24 = scalar_lea.vmem %s106_s22, 2048  ;;  %p1074_p2 = scmp.lt.s32.totalorder %s106_s22, %s106_s22 }
  0x2a   :  { %p1070_p1 = scmp.ne.s32.totalorder %s106_s22, %s1069_s24  ;;  %p1075_p3 = scmp.lt.s32.totalorder %s1069_s24, %s1069_s24 }
  0x2c   :  { %p1076_p4 = por %p1075_p3, %p1074_p2 }
  0x2e   :  { %p1077_p5 = pnand %p1076_p4, %p1070_p1 }
  0x30   :  { %1080 = shalt.err (!%p1077_p5)
}
  0x31   :  { %111 = dma.hbm_to_vmem [thread:$0]  %s1444_s7, 2048, %s106_s22, [#allocation15], %s1260_s1, %s1260_s1, %s1261_s18  }
  0x32   :  { %s1089_s5 = scalar_lea.vmem %s131_s23, 128  ;;  %p1094_p7 = scmp.lt.s32.totalorder %s131_s23, %s131_s23 }
  0x33   :  { %p1090_p6 = scmp.ne.s32.totalorder %s131_s23, %s1089_s5  ;;  %p1095_p8 = scmp.lt.s32.totalorder %s1089_s5, %s1089_s5 }
  0x35   :  { %p1096_p9 = por %p1095_p8, %p1094_p7 }
  0x37   :  { %p1097_p10 = pnand %p1096_p9, %p1090_p6 }
  0x39   :  { %1100 = shalt.err (!%p1097_p10)
}
  0x3a   :  { %133 = dma.hbm_to_vmem [thread:$0]  %s1447_s10, 128, %s131_s23, [#allocation18]  }
  0x3b   :  { %s1264_s29 = smov [#allocation2]   ;;  %s1265_s13 = smov [#allocation7]  }
  0x3c   :  { %s30_s30 = sshll.u32 %s1264_s29, 4  ;;  %s52_s14 = sshll.u32 %s1265_s13, 4  ;;  %s31_s30 = int_to_ptr.vmem [resolvable:$true] %s30_s30  ;;  %s53_s14 = int_to_ptr.vmem [resolvable:$true] %s52_s14 }
  0x3d   :  { %s1109_s15 = scalar_lea.vmem %s31_s30, 128  ;;  %p1114_p12 = scmp.lt.s32.totalorder %s31_s30, %s31_s30 }
  0x3e   :  { %p1110_p11 = scmp.ne.s32.totalorder %s31_s30, %s1109_s15  ;;  %p1115_p13 = scmp.lt.s32.totalorder %s1109_s15, %s1109_s15 }
  0x40   :  { %p1116_p0 = por %p1115_p13, %p1114_p12 }
  0x42   :  { %p1117_p1 = pnand %p1116_p0, %p1110_p11 }
  0x44   :  { %1120 = shalt.err (!%p1117_p1)
}
  0x45   :  { %33 = dma.hbm_to_vmem [thread:$0]  %s1437_s0, 128, %s31_s30, [#allocation3]  }
  0x46   :  { %s1129_s17 = scalar_lea.vmem %s53_s14, 32  ;;  %p1134_p3 = scmp.lt.s32.totalorder %s53_s14, %s53_s14 }
  0x47   :  { %p1130_p2 = scmp.ne.s32.totalorder %s53_s14, %s1129_s17  ;;  %p1135_p4 = scmp.lt.s32.totalorder %s1129_s17, %s1129_s17 }
  0x49   :  { %p1136_p5 = por %p1135_p4, %p1134_p3 }
  0x4b   :  { %p1137_p6 = pnand %p1136_p5, %p1130_p2 }
  0x4d   :  { %1140 = shalt.err (!%p1137_p6)
}
  0x4e   :  { %55 = dma.hbm_to_vmem [thread:$0]  %s1439_s2, 32, %s53_s14, [#allocation6]  }
  0x4f   :  { %s1266_s20 = smov [#allocation10]   ;;  %s1267_s22 = smov [#allocation13]  }
  0x50   :  { %s74_s21 = sshll.u32 %s1266_s20, 4  ;;  %s96_s3 = sshll.u32 %s1267_s22, 4  ;;  %s75_s21 = int_to_ptr.vmem [resolvable:$true] %s74_s21  ;;  %s97_s3 = int_to_ptr.vmem [resolvable:$true] %s96_s3 }
  0x51   :  { %s1149_s23 = scalar_lea.vmem %s75_s21, 32  ;;  %p1154_p8 = scmp.lt.s32.totalorder %s75_s21, %s75_s21 }
  0x52   :  { %p1150_p7 = scmp.ne.s32.totalorder %s75_s21, %s1149_s23  ;;  %p1155_p9 = scmp.lt.s32.totalorder %s1149_s23, %s1149_s23 }
  0x54   :  { %p1156_p10 = por %p1155_p9, %p1154_p8 }
  0x56   :  { %p1157_p11 = pnand %p1156_p10, %p1150_p7 }
  0x58   :  { %1160 = shalt.err (!%p1157_p11)
}
  0x59   :  { %77 = dma.hbm_to_vmem [thread:$0]  %s1441_s4, 32, %s75_s21, [#allocation9]  }
  0x5a   :  { %s1169_s25 = scalar_lea.vmem %s97_s3, 16  ;;  %s1173_s2 = scalar_lea.vmem %s97_s3, 32 }
  0x5b   :  { %p1170_p12 = scmp.ne.s32.totalorder %s97_s3, %s1169_s25  ;;  %p1174_p13 = scmp.lt.s32.totalorder %s97_s3, %s97_s3 }
  0x5c   :  { %p1175_p0 = scmp.lt.s32.totalorder %s1173_s2, %s1169_s25 }
  0x5e   :  { %p1176_p1 = por %p1175_p0, %p1174_p13 }
  0x60   :  { %p1177_p2 = pnand %p1176_p1, %p1170_p12 }
  0x62   :  { %1180 = shalt.err (!%p1177_p2)
}
  0x63   :  { %99 = dma.hbm_to_vmem [thread:$0]  %s1443_s6, 16, %s97_s3, [#allocation12]  }
  0x64   :  { %s1268_s27 = smov [#allocation16]   ;;  %s1269_s29 = smov [#allocation19]  }
  0x65   :  { %s118_s28 = sshll.u32 %s1268_s27, 4  ;;  %s139_s30 = sshll.u32 %s1269_s29, 4  ;;  %s119_s28 = int_to_ptr.vmem [resolvable:$true] %s118_s28  ;;  %s140_s30 = int_to_ptr.vmem [resolvable:$true] %s139_s30 }
  0x66   :  { %s1189_s13 = scalar_lea.vmem %s119_s28, 16  ;;  %s1193_s4 = scalar_lea.vmem %s119_s28, 32 }
  0x67   :  { %p1190_p3 = scmp.ne.s32.totalorder %s119_s28, %s1189_s13  ;;  %p1194_p4 = scmp.lt.s32.totalorder %s119_s28, %s119_s28 }
  0x68   :  { %p1195_p5 = scmp.lt.s32.totalorder %s1193_s4, %s1189_s13 }
  0x6a   :  { %p1196_p6 = por %p1195_p5, %p1194_p4 }
  0x6c   :  { %p1197_p7 = pnand %p1196_p6, %p1190_p3 }
  0x6e   :  { %1200 = shalt.err (!%p1197_p7)
}
  0x6f   :  { %121 = dma.hbm_to_vmem [thread:$0]  %s1445_s8, 16, %s119_s28, [#allocation15]  }
  0x70   :  { %s1209_s7 = scalar_lea.vmem %s140_s30, 1280  ;;  %p1214_p9 = scmp.lt.s32.totalorder %s140_s30, %s140_s30 }
  0x71   :  { %p1210_p8 = scmp.ne.s32.totalorder %s140_s30, %s1209_s7  ;;  %p1215_p10 = scmp.lt.s32.totalorder %s1209_s7, %s1209_s7 }
  0x73   :  { %p1216_p11 = por %p1215_p10, %p1214_p9 }
  0x75   :  { %p1217_p12 = pnand %p1216_p11, %p1210_p8 }
  0x77   :  { %1220 = shalt.err (!%p1217_p12)
}
  0x78   :  { %145 = dma.hbm_to_vmem [thread:$0]  %s1448_s11, 1280, %s140_s30, [#allocation18], %s1260_s1, %s1260_s1, %s1261_s18  }
  0x79   :  { %1241 = dma.done.wait [#allocation3], 128  }
  0x7a   :  { %1242 = vsyncadd [#allocation3], 4294967168 }
  0x7b   :  { %1243 = dma.done.wait [#allocation6], 1056  }
  0x7c   :  { %1244 = vsyncadd [#allocation6], 4294966240 }
  0x7d   :  { %1245 = dma.done.wait [#allocation9], 8224  }
  0x7e   :  { %1246 = vsyncadd [#allocation9], 4294959072 }
  0x7f   :  { %1247 = dma.done.wait [#allocation12], 2064  }
  0x80   :  { %1248 = vsyncadd [#allocation12], 4294965232 }
  0x81   :  { %1249 = dma.done.wait [#allocation15], 2064  }
  0x82   :  { %1250 = vsyncadd [#allocation15], 4294965232 }
  0x83   :  { %1251 = dma.done.wait [#allocation18], 1408  }
  0x84   :  { %1252 = vsyncadd [#allocation18], 4294965888  ;;  %v1270_v0 = vmov 0.0   ;;  %v187_v1 = vld [vmem:[#allocation5 + $0x38] sm:$0xff]  ;;  %v186_v2 = vld [vmem:[#allocation5 + $0x30] sm:$0xff]  ;;  %vm200_vm0 = vcmask 261120  }
  0x85   :  { %268 = vmatprep.mubr.f32.mxu1 %v1270_v0  ;;  %878 = vmatprep.subr.mxu0 %v1270_v0  ;;  %v185_v3 = vld [vmem:[#allocation5 + $0x28] sm:$0xff]  ;;  %v184_v4 = vld [vmem:[#allocation5 + $0x20] sm:$0xff]  ;;  %v183_v5 = vld [vmem:[#allocation5 + $0x18] sm:$0xff]  ;;  %vm1271_vm1 = vmmov 0  }
  0x86   :  { %228 = vmatprep.subr.mxu1 %v187_v1  ;;  %v182_v6 = vld [vmem:[#allocation5 + $0x10] sm:$0xff]  ;;  %v181_v7 = vld [vmem:[#allocation5 + $0x8] sm:$0xff]  ;;  %v180_v8 = vld [vmem:[#allocation5] sm:$0xff]  ;;  %910 = vmatprep.mubr.msk.f32.mxu0 %vm1271_vm1, %v1270_v0 }
  0x87   :  { %229 = vmatpush1.msra.mxu1 %v186_v2  ;;  %v179_v9 = vld [vmem:[#allocation2] sm:$0xff]  ;;  %v326_v12 = vld [vmem:[#allocation8 + $0xe8] sm:$0xff]  ;;  %v325_v13 = vld [vmem:[#allocation8 + $0xe0] sm:$0xff] }
  0x88   :  { %230 = vmatprep.subr.mxu1 %v185_v3  ;;  %v328_v10 = vld [vmem:[#allocation8 + $0xf8] sm:$0xff]  ;;  %v327_v11 = vld [vmem:[#allocation8 + $0xf0] sm:$0xff]  ;;  %v322_v16 = vld [vmem:[#allocation8 + $0xc8] sm:$0xff] }
  0x89   :  { %231 = vmatpush1.msra.mxu1 %v184_v4  ;;  %v324_v14 = vld [vmem:[#allocation8 + $0xd8] sm:$0xff]  ;;  %v323_v15 = vld [vmem:[#allocation8 + $0xd0] sm:$0xff]  ;;  %v321_v17 = vld [vmem:[#allocation8 + $0xc0] sm:$0xff] }
  0x8a   :  { %232 = vmatprep.subr.mxu1 %v183_v5  ;;  %v320_v18 = vld [vmem:[#allocation8 + $0xb8] sm:$0xff]  ;;  %v319_v19 = vld [vmem:[#allocation8 + $0xb0] sm:$0xff]  ;;  %v318_v20 = vld [vmem:[#allocation8 + $0xa8] sm:$0xff] }
  0x8b   :  { %233 = vmatpush1.msra.mxu1 %v182_v6  ;;  %v317_v21 = vld [vmem:[#allocation8 + $0xa0] sm:$0xff]  ;;  %v316_v22 = vld [vmem:[#allocation8 + $0x98] sm:$0xff]  ;;  %v315_v23 = vld [vmem:[#allocation8 + $0x90] sm:$0xff] }
  0x8c   :  { %234 = vmatprep.subr.mxu1 %v181_v7  ;;  %v314_v24 = vld [vmem:[#allocation8 + $0x88] sm:$0xff]  ;;  %v313_v25 = vld [vmem:[#allocation8 + $0x80] sm:$0xff]  ;;  %v312_v26 = vld [vmem:[#allocation8 + $0x78] sm:$0xff] }
  0x8d   :  { %235 = vmatpush1.msra.mxu1 %v180_v8  ;;  %v311_v27 = vld [vmem:[#allocation8 + $0x70] sm:$0xff]  ;;  %v310_v28 = vld [vmem:[#allocation8 + $0x68] sm:$0xff]  ;;  %v309_v29 = vld [vmem:[#allocation8 + $0x60] sm:$0xff] }
  0x8e   :  { %831 = vmatmul.mubr.msk.f32.vlgmr.msra.gmra.mxu1 %vm200_vm0, %v179_v9  ;;  %373 = vmatprep.subr.mxu1 %v328_v10  ;;  %v308_v30 = vld [vmem:[#allocation8 + $0x58] sm:$0xff]  ;;  %v307_v31 = vld [vmem:[#allocation8 + $0x50] sm:$0xff]  ;;  %v306_v32 = vld [vmem:[#allocation8 + $0x48] sm:$0xff] }
  0x8f   :  { %374 = vmatpush1.msra.mxu1 %v327_v11  ;;  %v305_v33 = vld [vmem:[#allocation8 + $0x40] sm:$0xff]  ;;  %v304_v34 = vld [vmem:[#allocation8 + $0x38] sm:$0xff]  ;;  %v303_v35 = vld [vmem:[#allocation8 + $0x30] sm:$0xff]  ;;  %v190_v11 = vlaneseq }
  0x90   :  { %375 = vmatprep.subr.mxu1 %v326_v12  ;;  %v302_v36 = vld [vmem:[#allocation8 + $0x28] sm:$0xff]  ;;  %v301_v37 = vld [vmem:[#allocation8 + $0x20] sm:$0xff]  ;;  %v300_v38 = vld [vmem:[#allocation8 + $0x18] sm:$0xff] }
  0x91   :  { %376 = vmatpush1.msra.mxu1 %v325_v13  ;;  %v299_v39 = vld [vmem:[#allocation8 + $0x10] sm:$0xff]  ;;  %v298_v40 = vld [vmem:[#allocation8 + $0x8] sm:$0xff]  ;;  %v297_v41 = vld [vmem:[#allocation8] sm:$0xff]  ;;  %v1385_v12 = vshrl.u32 %v190_v11, 7 }
  0x92   :  { %377 = vmatprep.subr.mxu1 %v324_v14  ;;  %v360_v42 = vld [vmem:[#allocation8 + $0x1f8] sm:$0xff]  ;;  %v359_v43 = vld [vmem:[#allocation8 + $0x1f0] sm:$0xff]  ;;  %v358_v44 = vld [vmem:[#allocation8 + $0x1e8] sm:$0xff] }
  0x93   :  { %378 = vmatpush1.msra.mxu1 %v323_v15  ;;  %v357_v45 = vld [vmem:[#allocation8 + $0x1e0] sm:$0xff]  ;;  %v356_v46 = vld [vmem:[#allocation8 + $0x1d8] sm:$0xff]  ;;  %v355_v47 = vld [vmem:[#allocation8 + $0x1d0] sm:$0xff]  ;;  %v192_v13 = vsub.s32 0, %v1385_v12  ;;  %v196_v15 = vsub.s32 1, %v1385_v12 }
  0x94   :  { %379 = vmatprep.subr.mxu1 %v322_v16  ;;  %v354_v48 = vld [vmem:[#allocation8 + $0x1c8] sm:$0xff]  ;;  %v353_v49 = vld [vmem:[#allocation8 + $0x1c0] sm:$0xff]  ;;  %v352_v50 = vld [vmem:[#allocation8 + $0x1b8] sm:$0xff] }
  0x95   :  { %380 = vmatpush1.msra.mxu1 %v321_v17  ;;  %v351_v51 = vld [vmem:[#allocation8 + $0x1b0] sm:$0xff]  ;;  %v350_v52 = vld [vmem:[#allocation8 + $0x1a8] sm:$0xff]  ;;  %v349_v53 = vld [vmem:[#allocation8 + $0x1a0] sm:$0xff] }
  0x96   :  { %381 = vmatprep.subr.mxu1 %v320_v18  ;;  %v348_v54 = vld [vmem:[#allocation8 + $0x198] sm:$0xff]  ;;  %v347_v55 = vld [vmem:[#allocation8 + $0x190] sm:$0xff]  ;;  %v346_v56 = vld [vmem:[#allocation8 + $0x188] sm:$0xff] }
  0x97   :  { %382 = vmatpush1.msra.mxu1 %v319_v19  ;;  %v345_v57 = vld [vmem:[#allocation8 + $0x180] sm:$0xff]  ;;  %v344_v58 = vld [vmem:[#allocation8 + $0x178] sm:$0xff]  ;;  %v343_v59 = vld [vmem:[#allocation8 + $0x170] sm:$0xff] }
  0x98   :  { %383 = vmatprep.subr.mxu1 %v318_v20  ;;  %v342_v60 = vld [vmem:[#allocation8 + $0x168] sm:$0xff]  ;;  %v341_v61 = vld [vmem:[#allocation8 + $0x160] sm:$0xff]  ;;  %v340_v62 = vld [vmem:[#allocation8 + $0x158] sm:$0xff] }
  0x99   :  { %384 = vmatpush1.msra.mxu1 %v317_v21  ;;  %v339_v63 = vld [vmem:[#allocation8 + $0x150] sm:$0xff]  ;;  %v338_v1 = vld [vmem:[#allocation8 + $0x148] sm:$0xff]  ;;  %v337_v2 = vld [vmem:[#allocation8 + $0x140] sm:$0xff] }
  0x9a   :  { %385 = vmatprep.subr.mxu1 %v316_v22  ;;  %v336_v3 = vld [vmem:[#allocation8 + $0x138] sm:$0xff]  ;;  %v335_v4 = vld [vmem:[#allocation8 + $0x130] sm:$0xff]  ;;  %v334_v5 = vld [vmem:[#allocation8 + $0x128] sm:$0xff] }
  0x9b   :  { %386 = vmatpush1.msra.mxu1 %v315_v23  ;;  %v333_v6 = vld [vmem:[#allocation8 + $0x120] sm:$0xff]  ;;  %v332_v7 = vld [vmem:[#allocation8 + $0x118] sm:$0xff]  ;;  %v331_v8 = vld [vmem:[#allocation8 + $0x110] sm:$0xff] }
  0x9c   :  { %387 = vmatprep.subr.mxu1 %v314_v24  ;;  %v330_v9 = vld [vmem:[#allocation8 + $0x108] sm:$0xff]  ;;  %v329_v10 = vld [vmem:[#allocation8 + $0x100] sm:$0xff]  ;;  %v188_v14 = vld [vmem:[#allocation7] sm:$0x3] }
  0x9d   :  { %388 = vmatpush1.msra.mxu1 %v313_v25  ;;  %v193_v16 = vrot.slane %v188_v14, %v192_v13  ;;  %v197_v17 = vrot.slane %v188_v14, %v196_v15 }
  0x9e   :  { %389 = vmatprep.subr.mxu1 %v312_v26 }
  0x9f   :  { %390 = vmatpush1.msra.mxu1 %v311_v27 }
  0xa0   :  { %391 = vmatprep.subr.mxu1 %v310_v28 }
  0xa1   :  { %392 = vmatpush1.msra.mxu1 %v309_v29 }
  0xa2   :  { %393 = vmatprep.subr.mxu1 %v308_v30 }
  0xa3   :  { %394 = vmatpush1.msra.mxu1 %v307_v31 }
  0xa4   :  { %395 = vmatprep.subr.mxu1 %v306_v32 }
  0xa5   :  { %396 = vmatpush1.msra.mxu1 %v305_v33 }
  0xa6   :  { %397 = vmatprep.subr.mxu1 %v304_v34 }
  0xa7   :  { %398 = vmatpush1.msra.mxu1 %v303_v35 }
  0xa8   :  { %399 = vmatprep.subr.mxu1 %v302_v36 }
  0xa9   :  { %400 = vmatpush1.msra.mxu1 %v301_v37 }
  0xaa   :  { %401 = vmatprep.subr.mxu1 %v300_v38  ;;  %v294_v38 = vld [vmem:[%s1446_s9 + $0x8] sm:$0xff] }
  0xab   :  { %402 = vmatpush1.msra.mxu1 %v299_v39 }
  0xac   :  { %403 = vmatprep.subr.mxu1 %v298_v40 }
  0xad   :  { %404 = vmatpush1.msra.mxu1 %v297_v41  ;;  %v293_v41 = vld [vmem:[%s1446_s9] sm:$0xff]  ;;  %s1274_s9 = smov [#allocation20]  }
  0xae   :  { %405 = vmatprep.subr.mxu1 %v360_v42  ;;  %s817_s17 = sshll.u32 %s1274_s9, 4  ;;  %s818_s17 = int_to_ptr.vmem [resolvable:$true] %s817_s17 }
  0xaf   :  { %406 = vmatpush2.msra.mxu1 %v359_v43  ;;  %s1221_s10 = scalar_lea.vmem %s818_s17, 128  ;;  %p1226_p0 = scmp.lt.s32.totalorder %s818_s17, %s818_s17 }
  0xb0   :  { %407 = vmatprep.subr.mxu1 %v358_v44  ;;  %v479_v44 = vld [vmem:[#allocation11 + $0x78] sm:$0xff]  ;;  %p1222_p13 = scmp.ne.s32.totalorder %s818_s17, %s1221_s10  ;;  %p1227_p1 = scmp.lt.s32.totalorder %s1221_s10, %s1221_s10 }
  0xb1   :  { %408 = vmatpush2.msra.mxu1 %v357_v45  ;;  %879 = vmatpush3.msra.mxu0 %v479_v44  ;;  %v478_v45 = vld [vmem:[#allocation11 + $0x70] sm:$0xff] }
  0xb2   :  { %409 = vmatprep.subr.mxu1 %v356_v46  ;;  %880 = vmatprep.subr.mxu0 %v1270_v0  ;;  %v477_v46 = vld [vmem:[#allocation11 + $0x68] sm:$0xff]  ;;  %p1228_p2 = por %p1227_p1, %p1226_p0 }
  0xb3   :  { %410 = vmatpush2.msra.mxu1 %v355_v47  ;;  %881 = vmatpush3.msra.mxu0 %v478_v45  ;;  %v476_v47 = vld [vmem:[#allocation11 + $0x60] sm:$0xff] }
  0xb4   :  { %411 = vmatprep.subr.mxu1 %v354_v48  ;;  %882 = vmatprep.subr.mxu0 %v1270_v0  ;;  %v475_v48 = vld [vmem:[#allocation11 + $0x58] sm:$0xff]  ;;  %p1229_p3 = pnand %p1228_p2, %p1222_p13 }
  0xb5   :  { %412 = vmatpush2.msra.mxu1 %v353_v49  ;;  %883 = vmatpush3.msra.mxu0 %v477_v46  ;;  %v474_v49 = vld [vmem:[#allocation11 + $0x50] sm:$0xff]  ;;  %v566_v46 = vld [vmem:[#allocation19 + $0x18] sm:$0xff] }
  0xb6   :  { %413 = vmatprep.subr.mxu1 %v352_v50  ;;  %884 = vmatprep.subr.mxu0 %v1270_v0  ;;  %v473_v50 = vld [vmem:[#allocation11 + $0x48] sm:$0xff] }
  0xb7   :  { %414 = vmatpush2.msra.mxu1 %v351_v51  ;;  %885 = vmatpush3.msra.mxu0 %v476_v47  ;;  %v472_v51 = vld [vmem:[#allocation11 + $0x40] sm:$0xff]  ;;  %v569_v47 = vld [vmem:[#allocation19 + $0x20] sm:$0xff] }
  0xb8   :  { %415 = vmatprep.subr.mxu1 %v350_v52  ;;  %886 = vmatprep.subr.mxu0 %v1270_v0  ;;  %v471_v52 = vld [vmem:[#allocation11 + $0x38] sm:$0xff] }
  0xb9   :  { %416 = vmatpush2.msra.mxu1 %v349_v53  ;;  %887 = vmatpush3.msra.mxu0 %v475_v48  ;;  %v470_v53 = vld [vmem:[#allocation11 + $0x30] sm:$0xff] }
  0xba   :  { %417 = vmatprep.subr.mxu1 %v348_v54  ;;  %888 = vmatprep.subr.mxu0 %v1270_v0  ;;  %v469_v54 = vld [vmem:[#allocation11 + $0x28] sm:$0xff] }
  0xbb   :  { %418 = vmatpush2.msra.mxu1 %v347_v55  ;;  %889 = vmatpush3.msra.mxu0 %v474_v49  ;;  %v468_v55 = vld [vmem:[#allocation11 + $0x20] sm:$0xff] }
  0xbc   :  { %419 = vmatprep.subr.mxu1 %v346_v56  ;;  %890 = vmatprep.subr.mxu0 %v1270_v0  ;;  %v467_v56 = vld [vmem:[#allocation11 + $0x18] sm:$0xff] }
  0xbd   :  { %420 = vmatpush2.msra.mxu1 %v345_v57  ;;  %891 = vmatpush3.msra.mxu0 %v473_v50  ;;  %v466_v57 = vld [vmem:[#allocation11 + $0x10] sm:$0xff] }
  0xbe   :  { %421 = vmatprep.subr.mxu1 %v344_v58  ;;  %892 = vmatprep.subr.mxu0 %v1270_v0  ;;  %v465_v58 = vld [vmem:[#allocation11 + $0x8] sm:$0xff]  ;;  %v572_v50 = vld [vmem:[#allocation19 + $0x28] sm:$0xff] }
  0xbf   :  { %422 = vmatpush2.msra.mxu1 %v343_v59  ;;  %893 = vmatpush3.msra.mxu0 %v472_v51  ;;  %v464_v59 = vld [vmem:[#allocation11] sm:$0xff] }
  0xc0   :  { %423 = vmatprep.subr.mxu1 %v342_v60  ;;  %894 = vmatprep.subr.mxu0 %v1270_v0  ;;  %v601_v60 = vld [vmem:[#allocation14 + $0x78] sm:$0xff] }
  0xc1   :  { %424 = vmatpush2.msra.mxu1 %v341_v61  ;;  %895 = vmatpush3.msra.mxu0 %v471_v52  ;;  %v361_v61 = vld [vmem:[#allocation10] sm:$0x3] }
  0xc2   :  { %425 = vmatprep.subr.mxu1 %v340_v62  ;;  %896 = vmatprep.subr.mxu0 %v1270_v0  ;;  %v366_v62 = vrot.slane %v361_v61, %v192_v13  ;;  %v575_v51 = vld [vmem:[#allocation19 + $0x30] sm:$0xff] }
  0xc3   :  { %426 = vmatpush2.msra.mxu1 %v339_v63  ;;  %897 = vmatpush3.msra.mxu0 %v470_v53  ;;  %v370_v63 = vrot.slane %v361_v61, %v196_v15  ;;  %v1273_v61 = vmov 1  }
  0xc4   :  { %427 = vmatprep.subr.mxu1 %v338_v1  ;;  %898 = vmatprep.subr.mxu0 %v1270_v0 }
  0xc5   :  { %428 = vmatpush2.msra.mxu1 %v337_v2  ;;  %899 = vmatpush3.msra.mxu0 %v469_v54  ;;  %v578_v54 = vld [vmem:[#allocation19 + $0x38] sm:$0xff] }
  0xc6   :  { %429 = vmatprep.subr.mxu1 %v336_v3  ;;  %900 = vmatprep.subr.mxu0 %v1270_v0 }
  0xc7   :  { %430 = vmatpush2.msra.mxu1 %v335_v4  ;;  %901 = vmatpush3.msra.mxu0 %v468_v55  ;;  %v581_v55 = vld [vmem:[#allocation19 + $0x40] sm:$0xff] }
  0xc8   :  { %431 = vmatprep.subr.mxu1 %v334_v5  ;;  %902 = vmatprep.subr.mxu0 %v1270_v0 }
  0xc9   :  { %432 = vmatpush2.msra.mxu1 %v333_v6  ;;  %903 = vmatpush3.msra.mxu0 %v467_v56 }
  0xca   :  { %433 = vmatprep.subr.mxu1 %v332_v7  ;;  %904 = vmatprep.subr.mxu0 %v1270_v0 }
  0xcb   :  { %434 = vmatpush2.msra.mxu1 %v331_v8  ;;  %905 = vmatpush3.msra.mxu0 %v466_v57 }
  0xcc   :  { %435 = vmatprep.subr.mxu1 %v330_v9  ;;  %906 = vmatprep.subr.mxu0 %v1270_v0 }
  0xcd   :  { %436 = vmatpush2.msra.mxu1 %v329_v10  ;;  %907 = vmatpush3.msra.mxu0 %v465_v58  ;;  %v584_v58 = vld [vmem:[#allocation19 + $0x48] sm:$0xff] }
  0xce   :  { %908 = vmatprep.subr.mxu0 %v1270_v0  ;;  %981 = vset.pattern.permute.xlu1 %v1273_v61 }
  0xcf   :  { %909 = vmatpush3.msra.mxu0 %v464_v59 }
  0xd0   :  { %913 = vmatprep.subr.mxu0 %v601_v60 }
 0x14e   :  { %v270_v18 = vpop.f32.mrf.mxu1 }
 0x14f   :  { %v271_v19 = vadd.f32 %v270_v18, %v193_v16 }
 0x150   :  { %v272_v20 = vpop.f32.mrf.mxu1 }
 0x151   :  { %v277_v21 = vmul.f32 0.044715, %v271_v19  ;;  %v273_v22 = vadd.f32 %v272_v20, %v197_v17  ;;  %v275_v35 = vmul.f32 0.5, %v271_v19 }
 0x153   :  { %v279_v23 = vmul.f32 %v277_v21, %v271_v19  ;;  %v278_v24 = vmul.f32 0.044715, %v273_v22  ;;  %v276_v36 = vmul.f32 0.5, %v273_v22 }
 0x155   :  { %v281_v25 = vmul.f32 %v279_v23, %v271_v19  ;;  %v280_v26 = vmul.f32 %v278_v24, %v273_v22  ;;  %v557_v23 = vld [vmem:[#allocation19] sm:$0xff] }
 0x157   :  { %v283_v27 = vadd.f32 %v281_v25, %v271_v19  ;;  %v282_v28 = vmul.f32 %v280_v26, %v273_v22  ;;  %v462_v19 = vld [vmem:[#allocation17] sm:$0xff]  ;;  %v600_v26 = vld [vmem:[#allocation14 + $0x70] sm:$0xff] }
 0x159   :  { %v285_v29 = vmul.f32 0.7978846, %v283_v27  ;;  %v284_v30 = vadd.f32 %v282_v28, %v273_v22  ;;  %v599_v28 = vld [vmem:[#allocation14 + $0x68] sm:$0xff] }
 0x15b   :  { %983 = vtanh.f32 %v285_v29  ;;  %v286_v31 = vmul.f32 0.7978846, %v284_v30  ;;  %v598_v29 = vld [vmem:[#allocation14 + $0x60] sm:$0xff]  ;;  %v597_v30 = vld [vmem:[#allocation14 + $0x58] sm:$0xff] }
 0x15d   :  { %985 = vtanh.f32 %v286_v31  ;;  %v596_v31 = vld [vmem:[#allocation14 + $0x50] sm:$0xff] }
 0x168   :  { %v984_v32 = vpop.eup %983 }
 0x169   :  { %v289_v33 = vadd.f32 1.0, %v984_v32  ;;  %v595_v32 = vld [vmem:[#allocation14 + $0x48] sm:$0xff] }
 0x16a   :  { %v986_v34 = vpop.eup %985 }
 0x16b   :  { %v290_v37 = vadd.f32 1.0, %v986_v34  ;;  %v291_v39 = vmul.f32 %v289_v33, %v275_v35  ;;  %v594_v33 = vld [vmem:[#allocation14 + $0x40] sm:$0xff]  ;;  %v593_v34 = vld [vmem:[#allocation14 + $0x38] sm:$0xff]  ;;  %v592_v35 = vld [vmem:[#allocation14 + $0x30] sm:$0xff] }
 0x16d   :  { %v292_v40 = vmul.f32 %v290_v37, %v276_v36  ;;  %v295_v43 = vmul.f32 %v293_v41, %v291_v39  ;;  %v591_v36 = vld [vmem:[#allocation14 + $0x28] sm:$0xff]  ;;  %v590_v37 = vld [vmem:[#allocation14 + $0x20] sm:$0xff]  ;;  %v588_v39 = vld [vmem:[#allocation14 + $0x10] sm:$0xff] }
 0x16e   :  { %v586_v41 = vld [vmem:[#allocation14] sm:$0xff] }
 0x16f   :  { %v296_v42 = vmul.f32 %v294_v38, %v292_v40  ;;  %v589_v38 = vld [vmem:[#allocation14 + $0x18] sm:$0xff]  ;;  %v587_v40 = vld [vmem:[#allocation14 + $0x8] sm:$0xff] }
 0x171   :  { %437 = vmatprep.mubr.f32.mxu1 %v296_v42  ;;  %v560_v42 = vld [vmem:[#allocation19 + $0x8] sm:$0xff] }
 0x172   :  { %438 = vmatmul.mubr.f32.vlgmr.msra.gmra.mxu1 %v295_v43  ;;  %v563_v43 = vld [vmem:[#allocation19 + $0x10] sm:$0xff] }
 0x232   :  { %v439_v1 = vpop.f32.mrf.mxu1 }
 0x233   :  { %v440_v2 = vadd.f32 %v439_v1, %v366_v62  ;;  %v832_v62 = vld [vmem:[#allocation13] ss:$0 sm:$0xff] }
 0x234   :  { %v441_v3 = vpop.f32.mrf.mxu1 }
 0x235   :  { %v446_v4 = vmul.f32 0.044715, %v440_v2  ;;  %v442_v5 = vadd.f32 %v441_v3, %v370_v63  ;;  %v444_v18 = vmul.f32 0.5, %v440_v2 }
 0x237   :  { %v448_v6 = vmul.f32 %v446_v4, %v440_v2  ;;  %v447_v7 = vmul.f32 0.044715, %v442_v5  ;;  %v445_v20 = vmul.f32 0.5, %v442_v5 }
 0x239   :  { %v450_v8 = vmul.f32 %v448_v6, %v440_v2  ;;  %v449_v9 = vmul.f32 %v447_v7, %v442_v5 }
 0x23b   :  { %v451_v10 = vmul.f32 %v449_v9, %v442_v5  ;;  %v452_v14 = vadd.f32 %v450_v8, %v440_v2 }
 0x23d   :  { %v453_v0 = vadd.f32 %v451_v10, %v442_v5  ;;  %v454_v16 = vmul.f32 0.7978846, %v452_v14 }
 0x23f   :  { %v455_v17 = vmul.f32 0.7978846, %v453_v0  ;;  %987 = vtanh.f32 %v454_v16  ;;  %v833_v0 = vld [vmem:[#allocation16] ss:$0 sm:$0xff] }
 0x241   :  { %989 = vtanh.f32 %v455_v17 }
 0x24c   :  { %v988_v13 = vpop.eup %987 }
 0x24d   :  { %v458_v12 = vadd.f32 1.0, %v988_v13 }
 0x24e   :  { %v990_v15 = vpop.eup %989 }
 0x24f   :  { %v459_v21 = vadd.f32 1.0, %v990_v15  ;;  %v460_v22 = vmul.f32 %v458_v12, %v444_v18 }
 0x251   :  { %v1419_v24 = vmul.f32 %v459_v21, %v445_v20  ;;  %v463_v25 = vmul.f32 %v462_v19, %v460_v22 }
 0x253   :  { %911 = vmatmul.mubr.f32.vlgmr.msra.gmra.mxu0 %v463_v25  ;;  %v558_v27 = vmul.f32 %v557_v23, %v1419_v24  ;;  %v561_v44 = vmul.f32 %v560_v42, %v1419_v24  ;;  %v564_v45 = vmul.f32 %v563_v43, %v1419_v24  ;;  %v567_v48 = vmul.f32 %v566_v46, %v1419_v24 }
 0x254   :  { %914 = vmatpush3.msra.mxu0 %v601_v60  ;;  %v570_v49 = vmul.f32 %v569_v47, %v1419_v24  ;;  %v573_v52 = vmul.f32 %v572_v50, %v1419_v24  ;;  %v576_v53 = vmul.f32 %v575_v51, %v1419_v24  ;;  %v579_v56 = vmul.f32 %v578_v54, %v1419_v24 }
 0x255   :  { %915 = vmatprep.subr.mxu0 %v600_v26  ;;  %945 = vmatprep.mubr.f32.mxu0 %v558_v27  ;;  %v582_v57 = vmul.f32 %v581_v55, %v1419_v24  ;;  %v585_v59 = vmul.f32 %v584_v58, %v1419_v24  ;;  %v1272_v60 = vmov 0  }
 0x256   :  { %916 = vmatpush3.msra.mxu0 %v600_v26  ;;  %980 = vset.pattern.permute.xlu0 %v1272_v60 }
 0x257   :  { %917 = vmatprep.subr.mxu0 %v599_v28 }
 0x258   :  { %918 = vmatpush3.msra.mxu0 %v599_v28 }
 0x259   :  { %919 = vmatprep.subr.mxu0 %v598_v29 }
 0x25a   :  { %920 = vmatpush3.msra.mxu0 %v598_v29 }
 0x25b   :  { %921 = vmatprep.subr.mxu0 %v597_v30 }
 0x25c   :  { %922 = vmatpush3.msra.mxu0 %v597_v30 }
 0x25d   :  { %923 = vmatprep.subr.mxu0 %v596_v31 }
 0x25e   :  { %924 = vmatpush3.msra.mxu0 %v596_v31 }
 0x25f   :  { %925 = vmatprep.subr.mxu0 %v595_v32 }
 0x260   :  { %926 = vmatpush3.msra.mxu0 %v595_v32 }
 0x261   :  { %927 = vmatprep.subr.mxu0 %v594_v33 }
 0x262   :  { %928 = vmatpush3.msra.mxu0 %v594_v33 }
 0x263   :  { %929 = vmatprep.subr.mxu0 %v593_v34 }
 0x264   :  { %930 = vmatpush3.msra.mxu0 %v593_v34 }
 0x265   :  { %931 = vmatprep.subr.mxu0 %v592_v35 }
 0x266   :  { %932 = vmatpush3.msra.mxu0 %v592_v35 }
 0x267   :  { %933 = vmatprep.subr.mxu0 %v591_v36 }
 0x268   :  { %934 = vmatpush3.msra.mxu0 %v591_v36 }
 0x269   :  { %935 = vmatprep.subr.mxu0 %v590_v37 }
 0x26a   :  { %936 = vmatpush3.msra.mxu0 %v590_v37 }
 0x26b   :  { %937 = vmatprep.subr.mxu0 %v589_v38 }
 0x26c   :  { %938 = vmatpush3.msra.mxu0 %v589_v38 }
 0x26d   :  { %939 = vmatprep.subr.mxu0 %v588_v39 }
 0x26e   :  { %940 = vmatpush3.msra.mxu0 %v588_v39 }
 0x26f   :  { %941 = vmatprep.subr.mxu0 %v587_v40 }
 0x270   :  { %942 = vmatpush3.msra.mxu0 %v587_v40 }
 0x271   :  { %943 = vmatprep.subr.mxu0 %v586_v41 }
 0x272   :  { %944 = vmatpush3.msra.mxu0 %v586_v41 }
 0x273   :  { %946 = vmatmul.mubr.f32.vlgmr.msra.gmra.mxu0 %v561_v44 }
 0x274   :  { %948 = vmatprep.mubr.f32.mxu0 %v564_v45 }
 0x277   :  { %949 = vmatmul.mubr.f32.gmra.mxu0 %v567_v48 }
 0x278   :  { %951 = vmatprep.mubr.f32.mxu0 %v570_v49 }
 0x27b   :  { %952 = vmatmul.mubr.f32.gmra.mxu0 %v573_v52 }
 0x27c   :  { %954 = vmatprep.mubr.f32.mxu0 %v576_v53 }
 0x27f   :  { %955 = vmatmul.mubr.f32.gmra.mxu0 %v579_v56 }
 0x280   :  { %957 = vmatprep.mubr.f32.mxu0 %v582_v57 }
 0x283   :  { %958 = vmatmul.mubr.f32.gmra.mxu0 %v585_v59 }
 0x313   :  { %v553_v63 = vpop.f32.mrf.mxu0 }
 0x314   :  { %v554_v1 = vadd.f32 %v832_v62, %v553_v63 }
 0x315   :  { %v912_v2 = vpop.f32.mrf.mxu0 }
 0x316   :  { %v774_v3 = vmin.f32 %v554_v1, 20.0  ;;  %v834_v4 = vmul.f32 -1.442695, %v554_v1  ;;  %vm773_vm2 = vcmp.gt.f32.partialorder %v554_v1, 20.0 }
 0x318   :  { %v775_v5 = vmul.f32 1.442695, %v774_v3  ;;  %991 = vpow2.f32 %v834_v4 }
 0x31a   :  { %993 = vpow2.f32 %v775_v5 }
 0x325   :  { %v992_v6 = vpop.eup %991 }
 0x326   :  { %v784_v7 = vadd.f32 1.0, %v992_v6 }
 0x327   :  { %v994_v8 = vpop.eup %993 }
 0x328   :  { %995 = vrcp.f32 %v784_v7  ;;  %v777_v9 = vadd.f32 1.0, %v994_v8 }
 0x32a   :  { %997 = vlog2.f32 %v777_v9 }
 0x333   :  { %v947_v10 = vpop.f32.mrf.mxu0 }
 0x334   :  { %v681_v12 = vadd.f32 %v947_v10, %v833_v0 }
 0x335   :  { %v996_v14 = vpop.eup %995  ;;  %v675_v16 = vpop.f32.mrf.mxu0 }
 0x336   :  { %v676_v17 = vadd.f32 %v833_v0, %v675_v16  ;;  %794 = vperm.xlu0 %980, %v996_v14  }
 0x337   :  { %v998_v13 = vpop.eup %997  ;;  %v950_v18 = vpop.f32.mrf.mxu0 }
 0x338   :  { %v779_v15 = vmul.f32 0.6931472, %v998_v13  ;;  %v725_v20 = vadd.f32 %v681_v12, %v676_v17  ;;  %v691_v24 = vadd.f32 %v950_v18, %v833_v0 }
 0x339   :  { %v685_v19 = vpop.f32.mrf.mxu0 }
 0x33a   :  { %v686_v21 = vadd.f32 %v833_v0, %v685_v19  ;;  %v780_v22 = vsel %vm773_vm2, %v554_v1, %v779_v15  ;;  %v788_v15 = vand.u32 127, %v190_v11 }
 0x33b   :  { %v953_v23 = vpop.f32.mrf.mxu0  ;;  %806 = vperm.xlu1 %981, %v780_v22  }
 0x33c   :  { %v726_v25 = vadd.f32 %v725_v20, %v686_v21  ;;  %v701_v30 = vadd.f32 %v953_v23, %v833_v0  ;;  %vm791_vm5 = vcmp.eq.s32.totalorder %v788_v15, 2  ;;  %vm790_vm6 = vcmp.eq.s32.totalorder %v788_v15, 1 }
 0x33d   :  { %v695_v26 = vpop.f32.mrf.mxu0  ;;  %vm789_vm7 = vcmp.eq.s32.totalorder %v788_v15, 0 }
 0x33e   :  { %v696_v27 = vadd.f32 %v833_v0, %v695_v26  ;;  %v727_v28 = vadd.f32 %v726_v25, %v691_v24 }
 0x33f   :  { %v956_v29 = vpop.f32.mrf.mxu0 }
 0x340   :  { %v728_v31 = vadd.f32 %v727_v28, %v696_v27  ;;  %v711_v36 = vadd.f32 %v956_v29, %v833_v0 }
 0x341   :  { %v705_v32 = vpop.f32.mrf.mxu0 }
 0x342   :  { %v706_v33 = vadd.f32 %v833_v0, %v705_v32  ;;  %v729_v34 = vadd.f32 %v728_v31, %v701_v30 }
 0x343   :  { %v959_v35 = vpop.f32.mrf.mxu0 }
 0x344   :  { %v730_v37 = vadd.f32 %v729_v34, %v706_v33  ;;  %v721_v41 = vadd.f32 %v959_v35, %v833_v0 }
 0x345   :  { %v715_v38 = vpop.f32.mrf.mxu0 }
 0x346   :  { %v716_v39 = vadd.f32 %v833_v0, %v715_v38  ;;  %v731_v40 = vadd.f32 %v730_v37, %v711_v36 }
 0x348   :  { %v732_v42 = vadd.f32 %v731_v40, %v716_v39 }
 0x34a   :  { %v733_v43 = vadd.f32 %v732_v42, %v721_v41 }
 0x34c   :  { %v734_v44 = vmul.f32 0.1, %v733_v43 }
 0x34e   :  { %v735_v45 = vsub.f32 %v676_v17, %v734_v44  ;;  %v738_v46 = vsub.f32 %v681_v12, %v734_v44  ;;  %v741_v47 = vsub.f32 %v686_v21, %v734_v44  ;;  %v744_v50 = vsub.f32 %v691_v24, %v734_v44 }
 0x34f   :  { %v747_v53 = vsub.f32 %v696_v27, %v734_v44  ;;  %v750_v56 = vsub.f32 %v701_v30, %v734_v44  ;;  %v753_v59 = vsub.f32 %v706_v33, %v734_v44  ;;  %v756_v63 = vsub.f32 %v711_v36, %v734_v44 }
 0x350   :  { %v736_v48 = vmul.f32 %v735_v45, %v735_v45  ;;  %v739_v49 = vmul.f32 %v738_v46, %v738_v46  ;;  %v742_v52 = vmul.f32 %v741_v47, %v741_v47  ;;  %v745_v55 = vmul.f32 %v744_v50, %v744_v50 }
 0x351   :  { %v748_v58 = vmul.f32 %v747_v53, %v747_v53  ;;  %v751_v62 = vmul.f32 %v750_v56, %v750_v56  ;;  %v754_v2 = vmul.f32 %v753_v59, %v753_v59  ;;  %v759_v3 = vsub.f32 %v716_v39, %v734_v44 }
 0x352   :  { %v740_v51 = vadd.f32 %v739_v49, %v736_v48  ;;  %v757_v5 = vmul.f32 %v756_v63, %v756_v63  ;;  %v762_v6 = vsub.f32 %v721_v41, %v734_v44 }
 0x353   :  { %v760_v8 = vmul.f32 %v759_v3, %v759_v3 }
 0x354   :  { %v743_v54 = vadd.f32 %v742_v52, %v740_v51  ;;  %v763_v10 = vmul.f32 %v762_v6, %v762_v6 }
 0x356   :  { %v746_v57 = vadd.f32 %v745_v55, %v743_v54 }
 0x358   :  { %v749_v60 = vadd.f32 %v748_v58, %v746_v57 }
 0x35a   :  { %v752_v1 = vadd.f32 %v751_v62, %v749_v60 }
 0x35c   :  { %v755_v4 = vadd.f32 %v754_v2, %v752_v1 }
 0x35e   :  { %v758_v7 = vadd.f32 %v757_v5, %v755_v4 }
 0x360   :  { %v761_v9 = vadd.f32 %v760_v8, %v758_v7 }
 0x362   :  { %v764_v14 = vadd.f32 %v763_v10, %v761_v9 }
 0x364   :  { %v765_v0 = vmul.f32 0.11111111, %v764_v14 }
 0x366   :  { %999 = vrsqrt.f32 %v765_v0  ;;  %vm768_vm3 = vcmp.eq.f32.partialorder %v765_v0, inf  ;;  %v771_v13 = vand.u32 2147483648, %v765_v0  ;;  %vm770_vm4 = vcmp.eq.f32.partialorder %v765_v0, 0.0 }
 0x373   :  { %v1000_v16 = vpop.eup %999 }
 0x374   :  { %v767_v17 = vmul.f32 %v1000_v16, %v765_v0 }
 0x376   :  { %v769_v18 = vsel %vm768_vm3, %v765_v0, %v767_v17 }
 0x377   :  { %v772_v12 = vsel %vm770_vm4, %v771_v13, %v769_v18 }
 0x378   :  { %800 = vperm.xlu0 %980, %v772_v12  }
 0x37c   :  { %982 = vset.pattern.permute.xlu0 %v1273_v61 }
 0x3b1   :  { %v795_v19 = vpop.permute.xlu0 %794 }
 0x3b2   :  { %v797_v20 = vsel %vm791_vm5, %v795_v19, 0.0 }
 0x3b6   :  { %v807_v22 = vpop.permute.xlu1 %806 }
 0x3f3   :  { %v801_v21 = vpop.permute.xlu0 %800 }
 0x3f4   :  { %v803_v23 = vsel %vm790_vm6, %v801_v21, %v797_v20 }
 0x3f5   :  { %v809_v24 = vsel %vm789_vm7, %v807_v22, %v803_v23 }
 0x3f6   :  { %810 = vst [vmem:[#allocation20] sm:$0xff] %v809_v24 }
 0x3f7   :  { %1232 = shalt.err (!%p1229_p3)
}
 0x3f8   :  { %820 = dma.vmem_to_hbm [thread:$0]  %s818_s17, 128, %s1449_s12, [#allocation4]  }
 0x3f9   :  { %1253 = dma.done.wait [#allocation4], 128  }
 0x3fa   :  { %1254 = vsyncadd [#allocation4], 4294967168 }
 0x3fb   :  { %824 = vsyncpa [#allocation3], 1 }
 0x3fc   :  { %825 = vsyncpa [#allocation6], 1 }
 0x3fd   :  { %826 = vsyncpa [#allocation9], 1 }
 0x3fe   :  { %827 = vsyncpa [#allocation12], 1 }
 0x3ff   :  { %828 = vsyncpa [#allocation15], 1 }
 0x400   :  { %829 = vsyncpa [#allocation18], 1 }
 0x401   :  { %830 = vsyncpa [#allocation4], 1 }

</bundles_post_ra>
